<compile_context>
chip_gen: v6e
topology: v6e:2x2x1
jax: 0.10.0
libtpu: 0.0.40
codegen_flags: <defaults>
</compile_context>

<pallas_src>
import jax
import jax.numpy as jnp
from jax.experimental import pallas as pl
from jax.experimental.pallas import tpu as pltpu


def _ce_with_probs_kernel(x_ref, t_ref, w_ref, loss_ref):
    """One (TN, C) tile of points: weighted soft-label cross entropy per row."""
    x = x_ref[...].astype(jnp.float32)        # (TN, C) logits
    t = t_ref[...].astype(jnp.float32)        # (TN, C) soft labels
    w = w_ref[...].astype(jnp.float32)        # (1,  C) class weights

    # Numerically stable logsumexp over the class (lane) axis.
    m = jnp.max(x, axis=-1, keepdims=True)                                  # (TN, 1)
    lse = m + jnp.log(jnp.sum(jnp.exp(x - m), axis=-1, keepdims=True))      # (TN, 1)

    # sum_c t*w*(lse - x) == lse * sum_c(t*w) - sum_c(t*w*x)
    tw = t * w                                                              # (TN, C)
    s_tw = jnp.sum(tw, axis=-1)                                             # (TN,)
    s_twx = jnp.sum(tw * x, axis=-1)                                        # (TN,)
    cum = lse[:, 0] * s_tw - s_twx                                          # (TN,)

    # Lane-dense store: output block is (1, TN).
    loss_ref[...] = cum[None, :]


def _round_up(x, m):
    return ((x + m - 1) // m) * m


def _pick_tile_rows(num_points, num_classes, in_itemsize, tgt_itemsize):
    # Two (TN, C) inputs, double-buffered by the pipeline, plus a few f32
    # in-kernel temporaries, must fit a conservative budget (v5e scoped-VMEM
    # default is only 16 MiB).
    budget_bytes = 8 * 1024 * 1024
    per_row = 2 * num_classes * (in_itemsize + tgt_itemsize) + 3 * num_classes * 4
    rows = budget_bytes // max(per_row, 1)
    tn = max(128, min(1024, (rows // 128) * 128))
    # Don't use a tile bigger than the (8-row aligned) problem itself.
    tn = min(tn, _round_up(num_points, 8))
    return tn


def cross_entropy_with_probs(inputs, target, weight=None, reduction="mean",
                             tile_rows=None):
    """Pallas TPU implementation of CrossEntropyWithProbs.forward."""
    if reduction not in ("none", "mean", "sum"):
        raise ValueError("Keyword 'reduction' must be one of ['none', 'mean', 'sum']")

    inputs = jnp.asarray(inputs)   # keep caller dtype (bf16 stays bf16 in HBM)
    target = jnp.asarray(target)
    num_points, num_classes = inputs.shape

    if weight is None:
        w2d = jnp.ones((1, num_classes), dtype=jnp.float32)
    else:
        w2d = jnp.asarray(weight, dtype=jnp.float32).reshape(1, num_classes)

    if tile_rows is None:
        tn = _pick_tile_rows(num_points, num_classes,
                             inputs.dtype.itemsize, target.dtype.itemsize)
    else:
        if tile_rows % 128 != 0 or tile_rows < 128:
            raise ValueError("tile_rows must be a positive multiple of 128")
        tn = min(tile_rows, _round_up(num_points, 8))

    num_tiles = pl.cdiv(num_points, tn)       # static Python int
    n_pad = num_tiles * tn                     # output rows incl. ragged tail

    per_point = pl.pallas_call(
        _ce_with_probs_kernel,
        out_shape=jax.ShapeDtypeStruct((1, n_pad), jnp.float32),
        grid_spec=pltpu.PrefetchScalarGridSpec(
            num_scalar_prefetch=0,
            grid=(num_tiles,),
            in_specs=[
                pl.BlockSpec((tn, num_classes), lambda i: (i, 0)),
                pl.BlockSpec((tn, num_classes), lambda i: (i, 0)),
                pl.BlockSpec((1, num_classes), lambda i: (0, 0)),  # grid-invariant
            ],
            out_specs=pl.BlockSpec((1, tn), lambda i: (0, i)),
        ),
        compiler_params=pltpu.CompilerParams(
            dimension_semantics=("parallel",),           # megacore-shardable
            vmem_limit_bytes=32 * 1024 * 1024,
        ),
    )(inputs, target, w2d)

    losses = per_point[0, :num_points]
    if reduction == "none":
        return losses
    if reduction == "mean":
        return jnp.mean(losses)
    return jnp.sum(losses)


def _reference(inputs, target, weight, reduction):
    x = jnp.asarray(inputs, jnp.float32)
    t = jnp.asarray(target, jnp.float32)
    logp = jax.nn.log_softmax(x, axis=-1)
    nll = -logp
    if weight is not None:
        nll = nll * jnp.asarray(weight, jnp.float32)[None, :]
    cum = jnp.sum(t * nll, axis=-1)
    if reduction == "none":
        return cum
    if reduction == "mean":
        return jnp.mean(cum)
    return jnp.sum(cum)


if __name__ == "__main__":
    key = jax.random.PRNGKey(0)
    k_x, k_t, k_w, k_x2, k_t2 = jax.random.split(key, 5)

    # --- Case 1: small f32 problem with class weights, all three reductions. ---
    num_points, num_classes = 8, 32
    logits = jax.random.normal(k_x, (num_points, num_classes), dtype=jnp.float32)
    raw = jax.random.uniform(k_t, (num_points, num_classes), dtype=jnp.float32)
    target = raw / jnp.sum(raw, axis=-1, keepdims=True)   # rows sum to 1
    weight = 0.5 + jax.random.uniform(k_w, (num_classes,), dtype=jnp.float32)

    out_mean = cross_entropy_with_probs(logits, target, weight=weight, reduction="mean")
    out_none = cross_entropy_with_probs(logits, target, weight=weight, reduction="none")
    out_sum = cross_entropy_with_probs(logits, target, weight=weight, reduction="sum")
    jax.block_until_ready((out_mean, out_none, out_sum))

    assert jnp.allclose(out_mean, _reference(logits, target, weight, "mean"),
                        atol=1e-5, rtol=1e-5)
    assert jnp.allclose(out_none, _reference(logits, target, weight, "none"),
                        atol=1e-5, rtol=1e-5)
    assert jnp.allclose(out_sum, _reference(logits, target, weight, "sum"),
                        atol=1e-5, rtol=1e-5)

    # --- Case 2: bf16 logits, no weights, multi-tile grid + ragged last tile
    #     (exercises the no-host-padding path: 300 rows, 128-row tiles). ---
    n2, c2 = 300, 32
    logits2 = jax.random.normal(k_x2, (n2, c2), dtype=jnp.float32).astype(jnp.bfloat16)
    raw2 = jax.random.uniform(k_t2, (n2, c2), dtype=jnp.float32)
    target2 = raw2 / jnp.sum(raw2, axis=-1, keepdims=True)

    out2 = cross_entropy_with_probs(logits2, target2, weight=None,
                                    reduction="none", tile_rows=128)
    jax.block_until_ready(out2)
    ref2 = _reference(logits2, target2, None, "none")
    assert out2.shape == (n2,)
    assert jnp.allclose(out2, ref2, atol=1e-4, rtol=1e-4)

    # --- Case 3: auto tile sizing, mean reduction, bf16, single ragged tile. ---
    out3 = cross_entropy_with_probs(logits2, target2, weight=None, reduction="mean")
    jax.block_until_ready(out3)
    assert jnp.allclose(out3, _reference(logits2, target2, None, "mean"),
                        atol=1e-4, rtol=1e-4)

    print("KERNEL_OK")
</pallas_src>

<mosaic_0001>
module attributes {stable_mosaic.version = 11 : i64} {
  func.func @_ce_with_probs_kernel(%arg0: i32, %arg1: memref<8x32xf32, #tpu.memory_space<vmem>>, %arg2: memref<8x32xf32, #tpu.memory_space<vmem>>, %arg3: memref<1x32xf32, #tpu.memory_space<vmem>>, %arg4: memref<1x8xf32, #tpu.memory_space<vmem>>) attributes {dimension_semantics = [#tpu.dimension_semantics<parallel>], iteration_bounds = array<i64: 1>, scalar_prefetch = 0 : i64, scratch_operands = 0 : i64, tpu.core_type = #tpu.core_type<tc>, window_params = [{transform_indices = @transform_0, window_bounds = array<i64: 8, 32>}, {transform_indices = @transform_1, window_bounds = array<i64: 8, 32>}, {pipeline_mode = #tpu.pipeline_mode<synchronous>, transform_indices = @transform_2, window_bounds = array<i64: 1, 32>}, {transform_indices = @transform_3, window_bounds = array<i64: 1, 8>}]} {
    %c0 = arith.constant 0 : index
    %c0_0 = arith.constant 0 : index
    %0 = vector.load %arg1[%c0, %c0_0] : memref<8x32xf32, #tpu.memory_space<vmem>>, vector<8x32xf32>
    %c0_1 = arith.constant 0 : index
    %c0_2 = arith.constant 0 : index
    %1 = vector.load %arg2[%c0_1, %c0_2] : memref<8x32xf32, #tpu.memory_space<vmem>>, vector<8x32xf32>
    %c0_3 = arith.constant 0 : index
    %c0_4 = arith.constant 0 : index
    %2 = vector.load %arg3[%c0_3, %c0_4] : memref<1x32xf32, #tpu.memory_space<vmem>>, vector<1x32xf32>
    %cst = arith.constant dense<0xFF800000> : vector<8xf32>
    %3 = vector.multi_reduction <maximumf>, %0, %cst [1] : vector<8x32xf32> to vector<8xf32>
    %4 = vector.shape_cast %3 : vector<8xf32> to vector<8x1xf32>
    %5 = vector.broadcast %4 : vector<8x1xf32> to vector<8x32xf32>
    %6 = arith.subf %0, %5 : vector<8x32xf32>
    %7 = math.exp %6 : vector<8x32xf32>
    %cst_5 = arith.constant dense<0.000000e+00> : vector<8xf32>
    %8 = vector.multi_reduction <add>, %7, %cst_5 [1] : vector<8x32xf32> to vector<8xf32>
    %9 = vector.shape_cast %8 : vector<8xf32> to vector<8x1xf32>
    %10 = math.log %9 : vector<8x1xf32>
    %11 = arith.addf %4, %10 : vector<8x1xf32>
    %12 = vector.broadcast %2 : vector<1x32xf32> to vector<8x32xf32>
    %13 = arith.mulf %1, %12 : vector<8x32xf32>
    %cst_6 = arith.constant dense<0.000000e+00> : vector<8xf32>
    %14 = vector.multi_reduction <add>, %13, %cst_6 [1] : vector<8x32xf32> to vector<8xf32>
    %15 = arith.mulf %13, %0 : vector<8x32xf32>
    %cst_7 = arith.constant dense<0.000000e+00> : vector<8xf32>
    %16 = vector.multi_reduction <add>, %15, %cst_7 [1] : vector<8x32xf32> to vector<8xf32>
    %17 = vector.shape_cast %11 : vector<8x1xf32> to vector<8xf32>
    %18 = arith.mulf %17, %14 : vector<8xf32>
    %19 = arith.subf %18, %16 : vector<8xf32>
    %20 = vector.shape_cast %19 : vector<8xf32> to vector<1x8xf32>
    %c0_8 = arith.constant 0 : index
    %c0_9 = arith.constant 0 : index
    %21 = vector.load %arg4[%c0_8, %c0_9] : memref<1x8xf32, #tpu.memory_space<vmem>>, vector<1x8xf32>
    tpu.vector_store %arg4[%c0_8, %c0_9], %20 {strides = array<i32>} : memref<1x8xf32, #tpu.memory_space<vmem>>, vector<1x8xf32>,
    return
  }
  func.func @transform_0(%arg0: i32) -> (i32, i32) {
    %c0_i32 = arith.constant 0 : i32
    %c0_i32_0 = arith.constant 0 : i32
    return %arg0, %c0_i32 : i32, i32
  }
  func.func @transform_1(%arg0: i32) -> (i32, i32) {
    %c0_i32 = arith.constant 0 : i32
    %c0_i32_0 = arith.constant 0 : i32
    return %arg0, %c0_i32 : i32, i32
  }
  func.func @transform_2(%arg0: i32) -> (i32, i32) {
    %c0_i32 = arith.constant 0 : i32
    %c0_i32_0 = arith.constant 0 : i32
    %c0_i32_1 = arith.constant 0 : i32
    return %c0_i32, %c0_i32_0 : i32, i32
  }
  func.func @transform_3(%arg0: i32) -> (i32, i32) {
    %c0_i32 = arith.constant 0 : i32
    %c0_i32_0 = arith.constant 0 : i32
    return %c0_i32, %arg0 : i32, i32
  }
}

</mosaic_0001>

<bundles_post_ra>
// kernel: tpu_custom_call.1
= control target key start
LH: loop header
LB: loop body
LE: loop exit
PB: predicated region body
PF: predicated region fallthrough
CT: control target
= control target key end

     0   :  { %8 = vsyncpa [#allocation3], 0  ;;  %s210_s0 = inlined_call_operand.hbm [shape: f32[8,32], index: 0, kind: input, shape index: {}]   ;;  %s211_s1 = inlined_call_operand.hbm [shape: f32[8,32], index: 1, kind: input, shape index: {}]   ;;  %s212_s2 = inlined_call_operand.vmem [shape: f32[1,32], index: 2, kind: input, shape index: {}]   ;;  %s213_s3 = inlined_call_operand.hbm [shape: f32[1,8], index: 3, kind: output, shape index: {}]  }
   0x1   :  { %9 = vsyncpa [#allocation6], 0 }
   0x2   :  { %10 = vsyncpa [#allocation4], 0  ;;  %s171_s12 = smov [#allocation2]   ;;  %s172_s14 = smov [#allocation5]  }
   0x3   :  { %s17_s13 = sshll.u32 %s171_s12, 4  ;;  %s27_s15 = sshll.u32 %s172_s14, 4  ;;  %s18_s13 = int_to_ptr.vmem [resolvable:$true] %s17_s13  ;;  %s28_s15 = int_to_ptr.vmem [resolvable:$true] %s27_s15 }
   0x4   :  { %s113_s16 = scalar_lea.vmem %s18_s13, 128  ;;  %p118_p1 = scmp.lt.s32.totalorder %s18_s13, %s18_s13 }
   0x5   :  { %p114_p0 = scmp.ne.s32.totalorder %s18_s13, %s113_s16  ;;  %p119_p2 = scmp.lt.s32.totalorder %s113_s16, %s113_s16 }
   0x7   :  { %p120_p3 = por %p119_p2, %p118_p1 }
   0x9   :  { %p121_p4 = pnand %p120_p3, %p114_p0 }
   0xb   :  { %124 = shalt.err (!%p121_p4)
}
   0xc   :  { %20 = dma.hbm_to_vmem [thread:$0]  %s210_s0, 128, %s18_s13, [#allocation3]  }
   0xd   :  { %s133_s19 = scalar_lea.vmem %s28_s15, 128  ;;  %p138_p6 = scmp.lt.s32.totalorder %s28_s15, %s28_s15 }
   0xe   :  { %p134_p5 = scmp.ne.s32.totalorder %s28_s15, %s133_s19  ;;  %p139_p7 = scmp.lt.s32.totalorder %s133_s19, %s133_s19 }
  0x10   :  { %p140_p8 = por %p139_p7, %p138_p6 }
  0x12   :  { %p141_p9 = pnand %p140_p8, %p134_p5 }
  0x14   :  { %144 = shalt.err (!%p141_p9)
}
  0x15   :  { %30 = dma.hbm_to_vmem [thread:$0]  %s211_s1, 128, %s28_s15, [#allocation6]  }
  0x16   :  { %165 = dma.done.wait [#allocation3], 128  }
  0x17   :  { %166 = vsyncadd [#allocation3], 4294967168 }
  0x18   :  { %167 = dma.done.wait [#allocation6], 128  }
  0x19   :  { %168 = vsyncadd [#allocation6], 4294967168  ;;  %vm42_vm0 = vcmask 261120   ;;  %v39_v0 = vld [vmem:[#allocation2] sm:$0xff]  ;;  %v40_v2 = vld [vmem:[#allocation5] sm:$0xff]  ;;  %v72_v14 = vlaneseq  ;;  %s173_s1 = smov [#allocation7]  }
  0x1a   :  { %v43_v1 = vsel %vm42_vm0, %v39_v0, -inf  ;;  %v97_v3 = vld [vmem:[%s212_s2] ss:$0 sm:$0xff]  ;;  %s87_s2 = sshll.u32 %s173_s1, 4  ;;  %vm79_vm1 = vcmask 57344   ;;  %s88_s2 = int_to_ptr.vmem [resolvable:$true] %s87_s2 }
  0x1b   :  { %44 = vmax.xlane.f32.xlu0 %v43_v1  ;;  %v61_v4 = vmul.f32 %v97_v3, %v40_v2  ;;  %v73_v18 = vand.u32 127, %v72_v14  ;;  %v75_v19 = vshrl.u32 %v72_v14, 7  ;;  %s145_s23 = scalar_lea.vmem %s88_s2, 16  ;;  %s149_s24 = scalar_lea.vmem %s88_s2, 32 }
  0x1c   :  { %p146_p10 = scmp.ne.s32.totalorder %s88_s2, %s145_s23  ;;  %p150_p11 = scmp.lt.s32.totalorder %s88_s2, %s88_s2 }
  0x1d   :  { %v62_v5 = vsel %vm42_vm0, %v61_v4, 0.0  ;;  %v65_v6 = vmul.f32 %v61_v4, %v39_v0  ;;  %v76_v23 = vsub.s32 %v73_v18, %v75_v19  ;;  %p151_p12 = scmp.lt.s32.totalorder %s149_s24, %s145_s23 }
  0x1e   :  { %63 = vadd.xlane.f32.xlu1 %v62_v5 }
  0x1f   :  { %v66_v7 = vsel %vm42_vm0, %v65_v6, 0.0  ;;  %p152_p13 = por %p151_p12, %p150_p11 }
  0x21   :  { %p153_p0 = pnand %p152_p13, %p146_p10 }
  0x22   :  { %67 = vadd.xlane.f32.xlu1 %v66_v7 }
  0xa4   :  { %v45_v8 = vpop.xlane.xlu0 %44 }
  0xa5   :  { %v46_v9 = vsub.f32 %v39_v0, %v45_v8 }
  0xa7   :  { %v47_v10 = vmul.f32 1.442695, %v46_v9  ;;  %v64_v15 = vpop.xlane.xlu1 %63 }
  0xa9   :  { %101 = vpow2.f32 %v47_v10 }
  0xab   :  { %v68_v21 = vpop.xlane.xlu1 %67 }
  0xb6   :  { %v102_v11 = vpop.eup %101 }
  0xb7   :  { %v49_v12 = vsel %vm42_vm0, %v102_v11, 0.0 }
  0xb8   :  { %50 = vadd.xlane.f32.xlu0 %v49_v12 }
 0x141   :  { %v51_v13 = vpop.xlane.xlu0 %50 }
 0x142   :  { %103 = vlog2.f32 %v51_v13 }
 0x14f   :  { %v104_v16 = vpop.eup %103 }
 0x150   :  { %v53_v17 = vmul.f32 0.6931472, %v104_v16 }
 0x152   :  { %v54_v20 = vadd.f32 %v53_v17, %v45_v8 }
 0x154   :  { %v69_v22 = vmul.f32 %v64_v15, %v54_v20 }
 0x156   :  { %v70_v24 = vsub.f32 %v69_v22, %v68_v21 }
 0x158   :  { %v77_v25 = vrot.slane %v70_v24, %v76_v23 }
 0x15a   :  { %80 = vst.msk [vmem:[#allocation7] sm:$0x1] %vm79_vm1, %v77_v25 }
 0x15b   :  { %156 = shalt.err (!%p153_p0)
}
 0x15c   :  { %90 = dma.vmem_to_hbm [thread:$0]  %s88_s2, 16, %s213_s3, [#allocation4]  }
 0x15d   :  { %169 = dma.done.wait [#allocation4], 16  }
 0x15e   :  { %170 = vsyncadd [#allocation4], 4294967280 }
 0x15f   :  { %94 = vsyncpa [#allocation3], 1 }
 0x160   :  { %95 = vsyncpa [#allocation6], 1 }
 0x161   :  { %96 = vsyncpa [#allocation4], 1 }

</bundles_post_ra>
